<compile_context>
chip_gen: v6e
topology: v6e:2x2x1
jax: 0.10.0
libtpu: 0.0.40
codegen_flags: <defaults>
</compile_context>

<pallas_src>
import functools

import jax
import jax.numpy as jnp
from jax import lax
from jax.experimental import pallas as pl
from jax.experimental.pallas import tpu as pltpu


# --------------------------------------------------------------------------
# Kernels
# --------------------------------------------------------------------------
def _pool_kernel(x_ref, p_ref, *, mt_total, inv_mt):
    """Mean over the merged M*T axis, accumulated directly into the output.

    x_ref : (tn, tmt, D) tile of feat (native dtype)
    p_ref : (tn, D) f32 pooled output; block index constant over the mt axis,
            so it stays resident and acts as the accumulator.
    """
    mt = pl.program_id(1)
    tmt = x_ref.shape[1]

    @pl.when(mt == 0)
    def _():
        p_ref[...] = jnp.zeros_like(p_ref)

    x = x_ref[...].astype(jnp.float32)
    if mt_total % tmt != 0:
        # Ragged last M*T tile: zero the out-of-range rows before accumulating
        # (out-of-bounds reads are unspecified).  No-op for full tiles.
        row = mt * tmt + lax.broadcasted_iota(jnp.int32, x.shape, 1)
        x = jnp.where(row < mt_total, x, 0.0)

    p_ref[...] += jnp.sum(x, axis=1)

    @pl.when(mt == pl.num_programs(1) - 1)
    def _():
        p_ref[...] = p_ref[...] * inv_mt


def _fc_norm_kernel(p_ref, w_ref, b_ref, o_ref, acc_ref):
    """fc1 + bias + L2 normalize, streaming the weight over the D axis.

    p_ref : (tn2, td)  pooled tile (f32)
    w_ref : (Hp, td)   weight tile (PyTorch (H, D) orientation, native dtype)
    b_ref : (1, Hp)    bias
    o_ref : (tn2, Hp)  output (written on last D step)
    acc_ref: (tn2, Hp) f32 accumulator scratch
    """
    d = pl.program_id(1)

    @pl.when(d == 0)
    def _():
        acc_ref[...] = jnp.zeros_like(acc_ref)

    lhs = p_ref[...]
    if lhs.dtype != w_ref.dtype:
        lhs = lhs.astype(w_ref.dtype)   # e.g. f32 pooled -> bf16 weight dtype

    # Contract dim 1 of both operands (== pooled @ W.T) on the MXU.
    acc_ref[...] += lax.dot_general(
        lhs, w_ref[...],
        dimension_numbers=(((1,), (1,)), ((), ())),
        preferred_element_type=jnp.float32,
        precision=lax.Precision.HIGHEST)

    @pl.when(d == pl.num_programs(1) - 1)
    def _():
        y = acc_ref[...] + b_ref[...].astype(jnp.float32)
        # F.normalize: y / max(||y||, 1e-12) == y * rsqrt(max(||y||^2, 1e-24))
        ss = jnp.sum(y * y, axis=-1, keepdims=True)
        inv = lax.rsqrt(jnp.maximum(ss, 1e-24))
        o_ref[...] = (y * inv).astype(o_ref.dtype)


# --------------------------------------------------------------------------
# Tiling / VMEM budgeting
# --------------------------------------------------------------------------
def _round_up(x, m):
    return (x + m - 1) // m * m


def _vmem_limit_bytes():
    """Generation-aware scoped-VMEM target (v5e/v6e: 128 MiB, v7x: 64 MiB)."""
    try:
        cap = pltpu.get_tpu_info().vmem_capacity_bytes
    except Exception:
        cap = 64 << 20            # conservative fallback (v7x per-core VMEM)
    return max(16 << 20, min(int(cap) * 3 // 4, 100 << 20))


def _stage1_tiles(N, MT, D, x_item, limit):
    """(tn1, tmt) for the feat-streaming stage; D stays full-extent."""
    sub = max(8, 32 // x_item)                       # sublane packing per dtype
    buf = max(1 << 20, limit // 5)                   # per pipeline buffer
    tn = min(_round_up(N, 8), 64)
    while tn > 8 and tn * sub * D * x_item > buf:
        tn = max(8, ((tn // 2) + 7) // 8 * 8)
    tmt = (buf // (tn * D * x_item)) // sub * sub
    tmt = max(sub, min(tmt, _round_up(MT, sub)))
    return tn, tmt


def _stage2_tiles(N, D, H, w_item, o_item, limit):
    """(tn2, td, Hp, Dp) for the fc1 stage.  td | Dp (no ragged D tiles) and
    tn2 as large as VMEM allows so the weight is streamed ~once total."""
    Hp = _round_up(H, 128)
    Dp = _round_up(D, 128)
    q = Dp // 128
    buf_w = max(1 << 20, limit // 4)
    td = 128
    for div in range(1, q + 1):
        if q % div == 0 and Hp * (128 * div) * w_item <= buf_w:
            td = 128 * div
    remaining = limit - 2 * Hp * td * w_item - Hp * 4          # minus bias
    row_bytes = 2 * td * 4 + Hp * 4 + 2 * Hp * o_item          # pooledx2+acc+outx2
    tn = max(8, min(_round_up(N, 8), (remaining // row_bytes) // 8 * 8, 1024))
    return tn, td, Hp, Dp


# --------------------------------------------------------------------------
# Wrapper
# --------------------------------------------------------------------------
def action_head_embed(feat, weight, bias, *, tn1=None, tmt=None, tn2=None,
                      td=None, out_dtype=None):
    """feat: (N, M, T, J, C); weight: (H, J*C); bias: (H,).  Returns (N, H)."""
    N, M, T, J, C = feat.shape
    D = J * C
    H = weight.shape[0]
    MT = M * T
    out_dtype = jnp.dtype(out_dtype or feat.dtype)

    limit = _vmem_limit_bytes()
    a_tn1, a_tmt = _stage1_tiles(N, MT, D, feat.dtype.itemsize, limit)
    tn1 = tn1 or a_tn1
    tmt = tmt or a_tmt
    a_tn2, a_td, Hp, Dp = _stage2_tiles(N, D, H, weight.dtype.itemsize,
                                        out_dtype.itemsize, limit)
    tn2 = tn2 or a_tn2
    td = td or a_td
    assert Dp % td == 0, "td must divide round_up(D, 128)"

    # dropout(p=0) is identity; mean over T then over M == mean over merged
    # M*T (equal T per M); row-major reshape of (J, C) matches torch.
    # The reshape is free (contiguous) — feat is never padded or copied.
    x = feat.reshape(N, MT, D)

    # ---- stage 1: streaming mean over M*T (HBM-bandwidth bound) ----
    pooled = pl.pallas_call(
        functools.partial(_pool_kernel, mt_total=MT, inv_mt=1.0 / MT),
        out_shape=jax.ShapeDtypeStruct((N, D), jnp.float32),
        grid_spec=pltpu.PrefetchScalarGridSpec(
            num_scalar_prefetch=0,
            grid=(pl.cdiv(N, tn1), pl.cdiv(MT, tmt)),
            in_specs=[pl.BlockSpec((tn1, tmt, D), lambda n, mt: (n, mt, 0))],
            out_specs=pl.BlockSpec((tn1, D), lambda n, mt: (n, 0))),
        compiler_params=pltpu.CompilerParams(
            dimension_semantics=("parallel", "arbitrary"),
            vmem_limit_bytes=limit),
    )(x)

    # ---- pad only the tiny operands (pooled / weight / bias), never feat ----
    if Dp != D:
        pooled = jnp.pad(pooled, ((0, 0), (0, Dp - D)))
        w = jnp.pad(weight, ((0, Hp - H), (0, Dp - D)))
    elif Hp != H:
        w = jnp.pad(weight, ((0, Hp - H), (0, 0)))
    else:
        w = weight
    b = bias if Hp == H else jnp.pad(bias, (0, Hp - H))
    b = b.reshape(1, Hp)

    # ---- stage 2: fc1 + bias + L2 normalize, streaming weight over D ----
    out = pl.pallas_call(
        _fc_norm_kernel,
        out_shape=jax.ShapeDtypeStruct((N, Hp), out_dtype),
        grid_spec=pltpu.PrefetchScalarGridSpec(
            num_scalar_prefetch=0,
            grid=(pl.cdiv(N, tn2), Dp // td),
            in_specs=[
                pl.BlockSpec((tn2, td), lambda n, d: (n, d)),
                pl.BlockSpec((Hp, td), lambda n, d: (0, d)),
                pl.BlockSpec((1, Hp), lambda n, d: (0, 0)),
            ],
            out_specs=pl.BlockSpec((tn2, Hp), lambda n, d: (n, 0)),
            scratch_shapes=[pltpu.VMEM((tn2, Hp), jnp.float32)]),
        compiler_params=pltpu.CompilerParams(
            dimension_semantics=("parallel", "arbitrary"),
            vmem_limit_bytes=limit),
    )(pooled, w, b)

    return out[:, :H]


# --------------------------------------------------------------------------
# Pure-JAX reference (mirrors the PyTorch forward)
# --------------------------------------------------------------------------
def _reference(feat, weight, bias):
    N, M, T, J, C = feat.shape
    f = jnp.transpose(feat, (0, 1, 3, 4, 2)).mean(axis=-1)   # (N, M, J, C)
    f = f.reshape(N, M, -1).mean(axis=1)                     # (N, J*C)
    f = jnp.dot(f, weight.T, precision=lax.Precision.HIGHEST) + bias
    n = jnp.maximum(jnp.linalg.norm(f, axis=-1, keepdims=True), 1e-12)
    return f / n


if __name__ == "__main__":
    # Small, module-consistent shapes: dim_rep=C=64, num_joints=J=4, hidden=64.
    # T=9 makes M*T=18 ragged vs the forced tmt=8 tile (exercises the mask).
    N, M, T, J, C = 2, 2, 9, 4, 64
    D = J * C          # fc1 in_features = dim_rep * num_joints = 256
    H = 64             # hidden_dim (padded to 128 lanes internally)

    key = jax.random.PRNGKey(0)
    k_feat, k_w, k_b = jax.random.split(key, 3)

    feat = jax.random.normal(k_feat, (N, M, T, J, C), dtype=jnp.float32)
    bound = 1.0 / (D ** 0.5)
    weight = jax.random.uniform(k_w, (H, D), minval=-bound, maxval=bound,
                                dtype=jnp.float32)
    bias = jax.random.uniform(k_b, (H,), minval=-bound, maxval=bound,
                              dtype=jnp.float32)

    ref = _reference(feat, weight, bias)

    # 1) Forced small tiles: >1 step on both reduction grids, ragged M*T tile.
    out_small = jax.block_until_ready(
        action_head_embed(feat, weight, bias, tmt=8, td=128))
    # 2) Auto tiles (production path).
    out_auto = jax.block_until_ready(action_head_embed(feat, weight, bias))

    for out in (out_small, out_auto):
        assert out.shape == (N, H)
        assert jnp.allclose(out, ref, atol=1e-5, rtol=1e-4), \
            float(jnp.max(jnp.abs(out - ref)))

    print("KERNEL_OK")
</pallas_src>

<mosaic_0001>
module attributes {stable_mosaic.version = 11 : i64} {
  func.func @_pool_kernel(%arg0: i32, %arg1: i32, %arg2: memref<8x8x256xf32, #tpu.memory_space<vmem>>, %arg3: memref<8x256xf32, #tpu.memory_space<vmem>>) attributes {dimension_semantics = [#tpu.dimension_semantics<parallel>, #tpu.dimension_semantics<arbitrary>], iteration_bounds = array<i64: 1, 3>, scalar_prefetch = 0 : i64, scratch_operands = 0 : i64, tpu.core_type = #tpu.core_type<tc>, window_params = [{transform_indices = @transform_0, window_bounds = array<i64: 8, 8, 256>}, {transform_indices = @transform_1, window_bounds = array<i64: 8, 256>}]} {
    %c0_i32 = arith.constant 0 : i32
    %0 = arith.cmpi eq, %arg1, %c0_i32 : i32
    %1 = arith.extui %0 : i1 to i32
    %c0_i32_0 = arith.constant 0 : i32
    %2 = arith.cmpi ne, %1, %c0_i32_0 : i32
    scf.if %2 {
      %cst_9 = arith.constant 0.000000e+00 : f32
      %19 = vector.broadcast %cst_9 : f32 to vector<8x256xf32>
      %c0_10 = arith.constant 0 : index
      %c0_11 = arith.constant 0 : index
      %20 = vector.load %arg3[%c0_10, %c0_11] : memref<8x256xf32, #tpu.memory_space<vmem>>, vector<8x256xf32>
      tpu.vector_store %arg3[%c0_10, %c0_11], %19 {strides = array<i32>} : memref<8x256xf32, #tpu.memory_space<vmem>>, vector<8x256xf32>,
    } else {
    }
    %c0 = arith.constant 0 : index
    %c0_1 = arith.constant 0 : index
    %c0_2 = arith.constant 0 : index
    %3 = vector.load %arg2[%c0, %c0_1, %c0_2] : memref<8x8x256xf32, #tpu.memory_space<vmem>>, vector<8x8x256xf32>
    %c8_i32 = arith.constant 8 : i32
    %4 = arith.muli %arg1, %c8_i32 : i32
    %5 = tpu.iota {dimensions = array<i32: 1>} : vector<8x8x256xi32>
    %6 = vector.broadcast %4 : i32 to vector<8x8x256xi32>
    %7 = arith.addi %6, %5 : vector<8x8x256xi32>
    %c18_i32 = arith.constant 18 : i32
    %8 = vector.broadcast %c18_i32 : i32 to vector<8x8x256xi32>
    %9 = arith.cmpi slt, %7, %8 : vector<8x8x256xi32>
    %cst = arith.constant 0.000000e+00 : f32
    %10 = vector.broadcast %cst : f32 to vector<8x8x256xf32>
    %11 = arith.select %9, %3, %10 : vector<8x8x256xi1>, vector<8x8x256xf32>
    %c0_3 = arith.constant 0 : index
    %c0_4 = arith.constant 0 : index
    %12 = vector.load %arg3[%c0_3, %c0_4] : memref<8x256xf32, #tpu.memory_space<vmem>>, vector<8x256xf32>
    %cst_5 = arith.constant dense<0.000000e+00> : vector<8x256xf32>
    %13 = vector.multi_reduction <add>, %11, %cst_5 [1] : vector<8x8x256xf32> to vector<8x256xf32>
    %14 = arith.addf %12, %13 : vector<8x256xf32>
    %c0_6 = arith.constant 0 : index
    %c0_7 = arith.constant 0 : index
    %15 = vector.load %arg3[%c0_6, %c0_7] : memref<8x256xf32, #tpu.memory_space<vmem>>, vector<8x256xf32>
    tpu.vector_store %arg3[%c0_6, %c0_7], %14 {strides = array<i32>} : memref<8x256xf32, #tpu.memory_space<vmem>>, vector<8x256xf32>,
    %c2_i32 = arith.constant 2 : i32
    %16 = arith.cmpi eq, %arg1, %c2_i32 : i32
    %17 = arith.extui %16 : i1 to i32
    %c0_i32_8 = arith.constant 0 : i32
    %18 = arith.cmpi ne, %17, %c0_i32_8 : i32
    scf.if %18 {
      %c0_9 = arith.constant 0 : index
      %c0_10 = arith.constant 0 : index
      %19 = vector.load %arg3[%c0_9, %c0_10] : memref<8x256xf32, #tpu.memory_space<vmem>>, vector<8x256xf32>
      %cst_11 = arith.constant 0.055555556 : f32
      %20 = vector.broadcast %cst_11 : f32 to vector<8x256xf32>
      %21 = arith.mulf %19, %20 : vector<8x256xf32>
      %c0_12 = arith.constant 0 : index
      %c0_13 = arith.constant 0 : index
      %22 = vector.load %arg3[%c0_12, %c0_13] : memref<8x256xf32, #tpu.memory_space<vmem>>, vector<8x256xf32>
      tpu.vector_store %arg3[%c0_12, %c0_13], %21 {strides = array<i32>} : memref<8x256xf32, #tpu.memory_space<vmem>>, vector<8x256xf32>,
    } else {
    }
    return
  }
  func.func @transform_0(%arg0: i32, %arg1: i32) -> (i32, i32, i32) {
    %c0_i32 = arith.constant 0 : i32
    %c0_i32_0 = arith.constant 0 : i32
    return %arg0, %arg1, %c0_i32 : i32, i32, i32
  }
  func.func @transform_1(%arg0: i32, %arg1: i32) -> (i32, i32) {
    %c0_i32 = arith.constant 0 : i32
    %c0_i32_0 = arith.constant 0 : i32
    return %arg0, %c0_i32 : i32, i32
  }
}

</mosaic_0001>

<bundles_post_ra>
// kernel: tpu_custom_call.1
= control target key start
LH: loop header
LB: loop body
LE: loop exit
PB: predicated region body
PF: predicated region fallthrough
CT: control target
= control target key end

     0   :  { %6 = vsyncpa [#allocation4], 0  ;;  %s802_s6 = smov 0   ;;  %s804_s7 = smov 0   ;;  %s953_s0 = inlined_call_operand.vmem [shape: f32[2,18,256], index: 0, kind: input, shape index: {}]   ;;  %s954_s1 = inlined_call_operand.hbm [shape: f32[2,256], index: 1, kind: output, shape index: {}]  }
   0x1   :  { %s806_s8 = smov 0   ;;  %s808_s9 = smov 0  }
   0x2   :  { %s810_s10 = smov 0  }
   0x3 LB: > { %s601_s11 = sadd.s32 4294967295, %s781_s10   ;;  %s21_s12 = sadd.s32 1, %s777_s9  ;;  %s781_s10 = sphi %s810_s10, %s12_s10   ;;  %s777_s9 = sphi %s808_s9, %s958_s9   ;;  %s773_s8 = sphi %s806_s8, %s957_s8   ;;  %s769_s7 = sphi %s804_s7, %s956_s7   ;;  %s765_s6 = sphi %s802_s6, %s955_s6  }
   0x4   : > { %p22_p0 = scmp.ge.s32.totalorder %s21_s12, 3  ;;  %p40_p1 = scmp.ne.s32.totalorder %s769_s7, %s765_s6 }
   0x5   : > { %p41_p2 = scmp.eq.s32.totalorder %s781_s10, 0  ;;  %s33_s14 = sadd.s32 1, %s769_s7 }
   0x6   : > { %s960_s12 = smov (%p22_p0, %s21_s12), 0  ;;  %p603_p5 = scmp.ge.s32.totalorder %s781_s10, 3 }
   0x7   : > { %p42_p3 = por %p41_p2, %p40_p1  ;;  %s29_s13 = ssub.s32 %s777_s9, %s960_s12 }
   0x8   : > { %p31_p4 = scmp.eq.s32.totalorder %s29_s13, 0  ;;  %92 = sbr.rel (%p603_p5) target bundleno = 26 (0x1a), region = 16 }
   0xa   : > { %s838_s15 = scalar_select %p31_p4, %s769_s7, %s33_s14  }
   0xd   : > { %95 = sbr.rel (!%p42_p3) target bundleno = 26 (0x1a), region = 20  ;;  %s97_s16 = sand.u32 (%p42_p3), 1, %s769_s7  }
   0xe   : > { %s622_s17 = sshll.u32 (%p42_p3), %s777_s9, 4  ;;  %s604_s18 = sshll.u32 (%p42_p3), %s97_s16, 7 }
   0xf   : > { %s109_s21 = scalar_lea.vmem (%p42_p3), %s953_s0, %s622_s17   ;;  %s99_s22 = scalar_lea.vmem (%p42_p3), [#allocation2], %s604_s18  }
  0x10   : > { %s783_s23 = smov (%p42_p3), 0  }
  0x12 LB: >> { %v125_v0 = vld [vmem:[%s109_s21] sm:$0xff]  ;;  %v127_v1 = vld [vmem:[%s109_s21 + $0x30] sm:$0xff]  ;;  %v129_v2 = vld [vmem:[%s109_s21 + $0x8] sm:$0xff]  ;;  %s119_s23 = sadd.s32 1, %s785_s23   ;;  %s785_s23 = sphi %s783_s23, %s119_s23  }
  0x13   : >> { %126 = vst [vmem:[%s99_s22] sm:$0xff] %v125_v0  ;;  %128 = vst [vmem:[%s99_s22 + $0x10] sm:$0xff] %v127_v1  ;;  %v131_v3 = vld [vmem:[%s109_s21 + $0x38] sm:$0xff]  ;;  %p118_p6 = scmp.ge.s32.totalorder %s119_s23, 1 }
  0x14   : >> { %130 = vst [vmem:[%s99_s22 + $0x8] sm:$0xff] %v129_v2  ;;  %132 = vst [vmem:[%s99_s22 + $0x18] sm:$0xff] %v131_v3 }
  0x15   : > { %121 = sbr.rel (!%p118_p6) target bundleno = 18 (0x12), region = 97 }
  0x1a PF: > { %p613_p7 = scmp.ge.s32.totalorder %s781_s10, 1  ;;  %p171_p8 = scmp.lt.s32.totalorder %s781_s10, 4 }
  0x1c   : > { %p172_p9 = pnand %p613_p7, %p171_p8 }
  0x1d   : > { %s178_s24 = sand.u32 (!%p172_p9), 1, %s765_s6   ;;  %p615_p10 = scmp.ne.s32.totalorder (!%p172_p9), %s773_s8, 0 }
  0x1e   : > { %175 = sbr.rel (%p172_p9) target bundleno = 137 (0x89), region = 50  ;;  %s614_s25 = sshll.u32 (!%p172_p9), %s178_s24, 7 }
  0x1f   : > { %s849_s26 = scalar_lea.vmem (!%p172_p9), [#allocation2], %s614_s25 }
  0x23   : > { %203 = sbr.rel (%p615_p10) target bundleno = 43 (0x2b), region = 58 }
  0x28   : > { %v787_v4 = vmov 0.0  }
  0x29   : > { %204 = vst [vmem:[#allocation3] sm:$0xf] %v787_v4  ;;  %205 = vst [vmem:[#allocation3 + $0x4] sm:$0xf] %v787_v4 }
  0x2a   : > { %206 = vst [vmem:[#allocation3 + $0x8] sm:$0xf] %v787_v4  ;;  %207 = vst [vmem:[#allocation3 + $0xc] sm:$0xf] %v787_v4 }
  0x2b PF: > { %s616_s27 = sshll.u32 %s773_s8, 3  ;;  %v225_v5 = vlaneseq  ;;  %v788_v7 = vmov 1983009808   ;;  %v208_v10 = vld [vmem:[%s849_s26] sm:$0xff]  ;;  %v209_v12 = vld [vmem:[%s849_s26 + $0x8] sm:$0xff]  ;;  %v210_v13 = vld [vmem:[%s849_s26 + $0x10] sm:$0xff] }
  0x2c   : > { %v227_v6 = vstv %s616_s27  ;;  %v364_v8 = vunpack.c.l.s4 %v788_v7  ;;  %v211_v14 = vld [vmem:[%s849_s26 + $0x18] sm:$0xff]  ;;  %v212_v16 = vld [vmem:[%s849_s26 + $0x20] sm:$0xff]  ;;  %v213_v18 = vld [vmem:[%s849_s26 + $0x28] sm:$0xff]  ;;  %vm431_vm1 = vcmask 1041409   ;;  %vm433_vm2 = vcmask 1043459   ;;  %p617_p11 = scmp.ne.s32.totalorder %s773_s8, 2 }
  0x2d   : > { %v226_v9 = vshrl.u32 %v225_v5, 7  ;;  %v214_v19 = vld [vmem:[%s849_s26 + $0x30] sm:$0xff]  ;;  %v215_v20 = vld [vmem:[%s849_s26 + $0x38] sm:$0xff]  ;;  %vm435_vm3 = vcmask 1045509   ;;  %v216_v1 = vld [vmem:[%s849_s26 + $0x40] sm:$0xff]  ;;  %vm437_vm4 = vcmask 1047559  }
  0x2e   : > { %v365_v11 = vunpack.c.0.s8 %v364_v8  ;;  %v217_v2 = vld [vmem:[%s849_s26 + $0x48] sm:$0xff] }
  0x2f   : > { %v857_v15 = vadd.s32 %v227_v6, %v226_v9 }
  0x30   : > { %v861_v17 = vsub.s32 %v365_v11, %v226_v9  ;;  %v218_v11 = vld [vmem:[%s849_s26 + $0x50] sm:$0xff] }
  0x31   : > { %vm229_vm0 = vcmp.lt.s32.totalorder %v857_v15, 18 }
  0x32   : > { %v230_v21 = vsel %vm229_vm0, %v208_v10, 0.0  ;;  %v231_v22 = vsel %vm229_vm0, %v209_v12, 0.0  ;;  %v232_v23 = vsel %vm229_vm0, %v210_v13, 0.0  ;;  %v233_v24 = vsel %vm229_vm0, %v211_v14, 0.0  ;;  %v219_v12 = vld [vmem:[%s849_s26 + $0x58] sm:$0xff] }
  0x33   : > { %v250_v25 = vrot.slane %v230_v21, 4  ;;  %v256_v26 = vrot.slane %v231_v22, 4  ;;  %v262_v27 = vrot.slane %v232_v23, 4  ;;  %v268_v28 = vrot.slane %v233_v24, 4 }
  0x34   : > { %v234_v29 = vsel %vm229_vm0, %v212_v16, 0.0  ;;  %v235_v30 = vsel %vm229_vm0, %v213_v18, 0.0  ;;  %v236_v31 = vsel %vm229_vm0, %v214_v19, 0.0  ;;  %v237_v32 = vsel %vm229_vm0, %v215_v20, 0.0 }
  0x35   : > { %v251_v33 = vadd.f32 %v250_v25, %v230_v21  ;;  %v257_v34 = vadd.f32 %v256_v26, %v231_v22  ;;  %v263_v35 = vadd.f32 %v262_v27, %v232_v23  ;;  %v269_v36 = vadd.f32 %v268_v28, %v233_v24  ;;  %v220_v23 = vld [vmem:[%s849_s26 + $0x60] sm:$0xff] }
  0x36   : > { %v274_v37 = vrot.slane %v234_v29, 4  ;;  %v280_v38 = vrot.slane %v235_v30, 4  ;;  %v286_v39 = vrot.slane %v236_v31, 4  ;;  %v292_v40 = vrot.slane %v237_v32, 4 }
  0x37   : > { %v252_v41 = vrot.slane %v251_v33, 2  ;;  %v258_v42 = vrot.slane %v257_v34, 2  ;;  %v264_v43 = vrot.slane %v263_v35, 2  ;;  %v270_v44 = vrot.slane %v269_v36, 2 }
  0x38   : > { %v275_v45 = vadd.f32 %v274_v37, %v234_v29  ;;  %v281_v46 = vadd.f32 %v280_v38, %v235_v30  ;;  %v287_v47 = vadd.f32 %v286_v39, %v236_v31  ;;  %v293_v48 = vadd.f32 %v292_v40, %v237_v32  ;;  %v221_v32 = vld [vmem:[%s849_s26 + $0x68] sm:$0xff] }
  0x39   : > { %v253_v49 = vadd.f32 %v252_v41, %v251_v33  ;;  %v259_v50 = vadd.f32 %v258_v42, %v257_v34  ;;  %v265_v51 = vadd.f32 %v264_v43, %v263_v35  ;;  %v271_v52 = vadd.f32 %v270_v44, %v269_v36  ;;  %v222_v41 = vld [vmem:[%s849_s26 + $0x70] sm:$0xff] }
  0x3a   : > { %v276_v53 = vrot.slane %v275_v45, 2  ;;  %v282_v54 = vrot.slane %v281_v46, 2  ;;  %v288_v55 = vrot.slane %v287_v47, 2  ;;  %v294_v56 = vrot.slane %v293_v48, 2 }
  0x3b   : > { %v254_v57 = vrot.slane %v253_v49, 1  ;;  %v260_v58 = vrot.slane %v259_v50, 1  ;;  %v266_v59 = vrot.slane %v265_v51, 1  ;;  %v272_v60 = vrot.slane %v271_v52, 1 }
  0x3c   : > { %v277_v61 = vadd.f32 %v276_v53, %v275_v45  ;;  %v283_v62 = vadd.f32 %v282_v54, %v281_v46  ;;  %v289_v63 = vadd.f32 %v288_v55, %v287_v47  ;;  %v295_v0 = vadd.f32 %v294_v56, %v293_v48  ;;  %v246_v46 = vld [vmem:[#allocation3] sm:$0xf]  ;;  %v223_v54 = vld [vmem:[%s849_s26 + $0x78] sm:$0xff] }
  0x3d   : > { %v255_v3 = vadd.f32 %v254_v57, %v253_v49  ;;  %v261_v4 = vadd.f32 %v260_v58, %v259_v50  ;;  %v267_v5 = vadd.f32 %v266_v59, %v265_v51  ;;  %v273_v6 = vadd.f32 %v272_v60, %v271_v52 }
  0x3e   : > { %v278_v7 = vrot.slane %v277_v61, 1  ;;  %v284_v8 = vrot.slane %v283_v62, 1  ;;  %v290_v9 = vrot.slane %v289_v63, 1  ;;  %v296_v10 = vrot.slane %v295_v0, 1 }
  0x3f   : > { %v362_v13 = vcombine.low %v255_v3, %v261_v4  ;;  %v370_v14 = vcombine.low %v267_v5, %v273_v6  ;;  %v238_v16 = vsel %vm229_vm0, %v216_v1, 0.0  ;;  %v239_v18 = vsel %vm229_vm0, %v217_v2, 0.0 }
  0x40   : > { %v279_v19 = vadd.f32 %v278_v7, %v277_v61  ;;  %v285_v20 = vadd.f32 %v284_v8, %v283_v62  ;;  %v291_v21 = vadd.f32 %v290_v9, %v289_v63  ;;  %v297_v22 = vadd.f32 %v296_v10, %v295_v0  ;;  %v247_v61 = vld [vmem:[#allocation3 + $0x4] sm:$0xf] }
  0x41   : > { %v369_v24 = vrot.slane %v362_v13, %v861_v17  ;;  %v377_v25 = vrot.slane %v370_v14, %v861_v17  ;;  %v240_v26 = vsel %vm229_vm0, %v218_v11, 0.0  ;;  %v241_v27 = vsel %vm229_vm0, %v219_v12, 0.0 }
  0x42   : > { %v378_v28 = vcombine.low %v279_v19, %v285_v20  ;;  %v386_v29 = vcombine.low %v291_v21, %v297_v22  ;;  %v298_v30 = vrot.slane %v238_v16, 4  ;;  %v304_v31 = vrot.slane %v239_v18, 4 }
  0x43   : > { %v430_v33 = vrot.slane %v377_v25, 7  ;;  %v310_v34 = vrot.slane %v240_v26, 4  ;;  %v316_v35 = vrot.slane %v241_v27, 4  ;;  %v242_v36 = vsel %vm229_vm0, %v220_v23, 0.0 }
  0x44   : > { %v385_v37 = vrot.slane %v378_v28, %v861_v17  ;;  %v393_v38 = vrot.slane %v386_v29, %v861_v17  ;;  %v299_v39 = vadd.f32 %v298_v30, %v238_v16  ;;  %v305_v40 = vadd.f32 %v304_v31, %v239_v18 }
  0x45   : > { %v432_v42 = vsel %vm431_vm1, %v430_v33, %v369_v24  ;;  %v311_v43 = vadd.f32 %v310_v34, %v240_v26  ;;  %v317_v44 = vadd.f32 %v316_v35, %v241_v27  ;;  %v243_v45 = vsel %vm229_vm0, %v221_v32, 0.0 }
  0x46   : > { %v434_v47 = vsel %vm433_vm2, %v430_v33, %v432_v42  ;;  %v441_v48 = vrot.slane %v393_v38, 7  ;;  %v300_v49 = vrot.slane %v299_v39, 2  ;;  %v306_v50 = vrot.slane %v305_v40, 2 }
  0x47   : > { %v436_v51 = vsel %vm435_vm3, %v430_v33, %v434_v47  ;;  %v312_v52 = vrot.slane %v311_v43, 2  ;;  %v318_v53 = vrot.slane %v317_v44, 2  ;;  %v244_v55 = vsel %vm229_vm0, %v222_v41, 0.0 }
  0x48   : > { %v438_v56 = vsel %vm437_vm4, %v430_v33, %v436_v51  ;;  %v442_v57 = vsel %vm431_vm1, %v441_v48, %v385_v37  ;;  %v301_v58 = vadd.f32 %v300_v49, %v299_v39  ;;  %v307_v59 = vadd.f32 %v306_v50, %v305_v40  ;;  %v248_v40 = vld [vmem:[#allocation3 + $0x8] sm:$0xf] }
  0x49   : > { %v464_v60 = vadd.f32 %v438_v56, %v246_v46  ;;  %v443_v62 = vsel %vm433_vm2, %v441_v48, %v442_v57  ;;  %v313_v63 = vadd.f32 %v312_v52, %v311_v43  ;;  %v319_v0 = vadd.f32 %v318_v53, %v317_v44 }
  0x4a   : > { %v444_v1 = vsel %vm435_vm3, %v441_v48, %v443_v62  ;;  %v302_v2 = vrot.slane %v301_v58, 1  ;;  %v308_v3 = vrot.slane %v307_v59, 1  ;;  %v245_v4 = vsel %vm229_vm0, %v223_v54, 0.0 }
  0x4b   : > { %468 = vst [vmem:[#allocation3] sm:$0xf] %v464_v60  ;;  %v445_v5 = vsel %vm437_vm4, %v441_v48, %v444_v1  ;;  %v314_v6 = vrot.slane %v313_v63, 1  ;;  %v320_v7 = vrot.slane %v319_v0, 1  ;;  %v322_v8 = vrot.slane %v242_v36, 4 }
  0x4c   : > { %v465_v9 = vadd.f32 %v445_v5, %v247_v61  ;;  %v303_v10 = vadd.f32 %v302_v2, %v301_v58  ;;  %v309_v11 = vadd.f32 %v308_v3, %v307_v59  ;;  %v328_v12 = vrot.slane %v243_v45, 4 }
  0x4d   : > { %v315_v13 = vadd.f32 %v314_v6, %v313_v63  ;;  %v321_v14 = vadd.f32 %v320_v7, %v319_v0  ;;  %v323_v16 = vadd.f32 %v322_v8, %v242_v36  ;;  %v334_v18 = vrot.slane %v244_v55, 4 }
  0x4e   : > { %469 = vst [vmem:[#allocation3 + $0x4] sm:$0xf] %v465_v9  ;;  %v394_v19 = vcombine.low %v303_v10, %v309_v11  ;;  %v329_v20 = vadd.f32 %v328_v12, %v243_v45  ;;  %v340_v21 = vrot.slane %v245_v4, 4 }
  0x4f   : > { %v402_v15 = vcombine.low %v315_v13, %v321_v14  ;;  %v324_v22 = vrot.slane %v323_v16, 2  ;;  %v335_v23 = vadd.f32 %v334_v18, %v244_v55  ;;  %v249_v55 = vld [vmem:[#allocation3 + $0xc] sm:$0xf] }
  0x50   : > { %v330_v24 = vrot.slane %v329_v20, 2  ;;  %v341_v25 = vadd.f32 %v340_v21, %v245_v4  ;;  %v401_v26 = vrot.slane %v394_v19, %v861_v17 }
  0x51   : > { %v409_v27 = vrot.slane %v402_v15, %v861_v17  ;;  %v325_v28 = vadd.f32 %v324_v22, %v323_v16  ;;  %v336_v29 = vrot.slane %v335_v23, 2 }
  0x52   : > { %v331_v30 = vadd.f32 %v330_v24, %v329_v20  ;;  %v342_v31 = vrot.slane %v341_v25, 2 }
  0x53   : > { %v448_v32 = vrot.slane %v409_v27, 7  ;;  %v326_v33 = vrot.slane %v325_v28, 1  ;;  %v337_v34 = vadd.f32 %v336_v29, %v335_v23 }
  0x54   : > { %v332_v35 = vrot.slane %v331_v30, 1  ;;  %v343_v36 = vadd.f32 %v342_v31, %v341_v25 }
  0x55   : > { %v449_v37 = vsel %vm431_vm1, %v448_v32, %v401_v26  ;;  %v327_v38 = vadd.f32 %v326_v33, %v325_v28  ;;  %v338_v39 = vrot.slane %v337_v34, 1 }
  0x56   : > { %v450_v41 = vsel %vm433_vm2, %v448_v32, %v449_v37  ;;  %v333_v42 = vadd.f32 %v332_v35, %v331_v30  ;;  %v344_v43 = vrot.slane %v343_v36, 1 }
  0x57   : > { %v451_v44 = vsel %vm435_vm3, %v448_v32, %v450_v41  ;;  %v339_v45 = vadd.f32 %v338_v39, %v337_v34 }
  0x58   : > { %v452_v46 = vsel %vm437_vm4, %v448_v32, %v451_v44  ;;  %v345_v47 = vadd.f32 %v344_v43, %v343_v36  ;;  %v410_v48 = vcombine.low %v327_v38, %v333_v42 }
  0x59   : > { %v466_v49 = vadd.f32 %v452_v46, %v248_v40 }
  0x5a   : > { %v418_v50 = vcombine.low %v339_v45, %v345_v47  ;;  %v417_v51 = vrot.slane %v410_v48, %v861_v17 }
  0x5b   : > { %470 = vst [vmem:[#allocation3 + $0x8] sm:$0xf] %v466_v49 }
  0x5c   : > { %v425_v52 = vrot.slane %v418_v50, %v861_v17 }
  0x5e   : > { %v455_v53 = vrot.slane %v425_v52, 7 }
  0x60   : > { %v456_v54 = vsel %vm431_vm1, %v455_v53, %v417_v51 }
  0x61   : > { %v457_v56 = vsel %vm433_vm2, %v455_v53, %v456_v54 }
  0x62   : > { %v458_v57 = vsel %vm435_vm3, %v455_v53, %v457_v56  ;;  %475 = sbr.rel (%p617_p11) target bundleno = 113 (0x71), region = 62 }
  0x63   : > { %v459_v58 = vsel %vm437_vm4, %v455_v53, %v458_v57 }
  0x64   : > { %v467_v59 = vadd.f32 %v459_v58, %v249_v55 }
  0x66   : > { %471 = vst [vmem:[#allocation3 + $0xc] sm:$0xf] %v467_v59 }
  0x67   : > { %v476_v60 = vld [vmem:[#allocation3] sm:$0xf]  ;;  %v477_v61 = vld [vmem:[#allocation3 + $0x4] sm:$0xf]  ;;  %v478_v62 = vld [vmem:[#allocation3 + $0x8] sm:$0xf] }
  0x68   : > { %v480_v63 = vmul.f32 0.055555556, %v476_v60  ;;  %v481_v17 = vmul.f32 0.055555556, %v477_v61  ;;  %v482_v0 = vmul.f32 0.055555556, %v478_v62 }
  0x6a   : > { %484 = vst [vmem:[#allocation3] sm:$0xf] %v480_v63  ;;  %485 = vst [vmem:[#allocation3 + $0x4] sm:$0xf] %v481_v17 }
  0x6b   : > { %486 = vst [vmem:[#allocation3 + $0x8] sm:$0xf] %v482_v0 }
  0x6d   : > { %v479_v1 = vld [vmem:[#allocation3 + $0xc] sm:$0xf] }
  0x6e   : > { %v483_v2 = vmul.f32 0.055555556, %v479_v1 }
  0x70   : > { %487 = vst [vmem:[#allocation3 + $0xc] sm:$0xf] %v483_v2 }
  0x71 PF: > { %p618_p12 = scmp.ne.s32.totalorder %s601_s11, 2 }
  0x73   : > { %490 = sbr.rel (%p618_p12) target bundleno = 133 (0x85), region = 66 }
  0x78   : > { %497 = vsyncadd [#allocation4], 192  ;;  %s789_s28 = smov [#allocation3]  }
  0x79   : > { %s503_s29 = sshll.u32 %s789_s28, 4  ;;  %s504_s29 = int_to_ptr.vmem [resolvable:$true] %s503_s29 }
  0x7a   : > { %s703_s30 = scalar_lea.vmem %s504_s29, 64  ;;  %s707_s2 = scalar_lea.vmem %s504_s29, 256 }
  0x7b   : > { %p704_p13 = scmp.ne.s32.totalorder %s504_s29, %s703_s30  ;;  %p708_p0 = scmp.lt.s32.totalorder %s504_s29, %s504_s29 }
  0x7c   : > { %p709_p1 = scmp.lt.s32.totalorder %s707_s2, %s703_s30 }
  0x7e   : > { %p710_p2 = por %p709_p1, %p708_p0 }
  0x80   : > { %p711_p3 = pnand %p710_p2, %p704_p13 }
  0x82   : > { %714 = shalt.err (!%p711_p3)
}
  0x83   : > { %s790_s3 = smov 64   ;;  %s791_s4 = smov 4  }
  0x84   : > { %509 = dma.vmem_to_hbm [thread:$0]  %s504_s29, 64, %s954_s1, [#allocation4], %s790_s3, %s790_s3, %s791_s4  }
  0x85 PF: > { %p625_p4 = scmp.eq.s32.totalorder %s601_s11, 2 }
  0x87   : > { %760 = dma.done.wait (%p625_p4), [#allocation4], 256  }
  0x88   : > { %762 = vsyncadd (%p625_p4), [#allocation4], 4294967040 }
  0x89 PF: > { %s12_s10 = sadd.s32 1, %s781_s10   ;;  %s955_s6 = smov %s769_s7 }
  0x8a   : > { %p9_p5 = scmp.ge.s32.totalorder %s12_s10, 5   ;;  %s956_s7 = smov %s838_s15 }
  0x8b   : > { %s957_s8 = smov %s777_s9  ;;  %s958_s9 = smov %s960_s12 }
  0x8c   :  { %11 = sbr.rel (!%p9_p5) target bundleno = 3 (0x3), region = 119 }
  0x91   :  { %519 = vsyncpa [#allocation4], 1 }
  0x92   :  { %521 = vsyncpa [#allocation4 + $0x1], 1 }

</bundles_post_ra>
